<compile_context>
chip_gen: v5e
topology: v5e:2x2
jax: 0.10.0
libtpu: 0.0.40
codegen_flags: <defaults>
</compile_context>

<pallas_src>
import jax
import jax.numpy as jnp
from jax import lax
from jax.experimental import pallas as pl
from jax.experimental.pallas import tpu as pltpu

BN_EPS = 1e-5
LEAKY_SLOPE = 0.2

LANE = 128      # vreg lane width   (last dim)
SUBLANE = 8     # vreg sublane width (second-to-last dim)


def _leaky_relu(x):
    return jnp.where(x >= 0, x, LEAKY_SLOPE * x)


def _round_up(v, m):
    return (v + m - 1) // m * m


def encoder_kernel(nvalid_ref,                       # SMEM: (1,) int32, real batch size
                   x_ref, gamma_ref, beta_ref,       # VMEM
                   w1_ref, b1_ref, w2_ref, b2_ref,   # VMEM (weights in (out, in) layout)
                   o_ref):
    x = x_ref[...].astype(jnp.float32)               # (Bp, Np), lane-dense
    nvalid = nvalid_ref[0]
    inv_n = 1.0 / nvalid.astype(jnp.float32)

    # Padded batch rows are zero-filled by the wrapper; mask them out of the
    # statistics so padding never changes the BatchNorm result.
    row_ids = lax.broadcasted_iota(jnp.int32, x.shape, 0)
    rowmask = (row_ids < nvalid).astype(jnp.float32)

    # --- BatchNorm1d, training-mode batch statistics (biased variance) ---
    mean = jnp.sum(x, axis=0, keepdims=True) * inv_n          # padded rows are 0
    centered = (x - mean) * rowmask                           # zero padded rows
    var = jnp.sum(centered * centered, axis=0, keepdims=True) * inv_n
    xhat = centered * lax.rsqrt(var + BN_EPS)                 # rsqrt -> EUP slot
    y = xhat * gamma_ref[...] + beta_ref[...]

    # --- LeakyReLU(0.2) ---
    y = _leaky_relu(y)

    # --- Linear 1: y @ W1^T + b1.  W1 is (out, in); contract on both last
    #     dims so no transpose is ever materialized. ---
    mxu_dtype = w1_ref.dtype
    dn = (((1,), (1,)), ((), ()))
    y = lax.dot_general(y.astype(mxu_dtype), w1_ref[...],
                        dimension_numbers=dn,
                        preferred_element_type=jnp.float32) + b1_ref[...]

    # --- LeakyReLU(0.2) ---
    y = _leaky_relu(y)

    # --- Linear 2 ---
    y = lax.dot_general(y.astype(mxu_dtype), w2_ref[...],
                        dimension_numbers=dn,
                        preferred_element_type=jnp.float32) + b2_ref[...]

    o_ref[...] = y.astype(o_ref.dtype)


def encoder_forward(x, gamma, beta, w1, b1, w2, b2, *, mxu_dtype=None):
    """x: (B, N) f32.  w1/w2: (N, N) in PyTorch (out, in) layout.  Returns (B, N)."""
    B, N = x.shape
    Bp = _round_up(B, SUBLANE)
    Np = _round_up(N, LANE)          # lane-dense feature width

    if mxu_dtype is None:
        # bf16 MXU operands only pay off once the tiles are non-trivial;
        # elementwise math stays f32 regardless (v5e has no bf16 VPU).
        mxu_dtype = jnp.bfloat16 if Np >= 256 else jnp.float32

    pad_b = Bp - B
    pad_f = Np - N

    xp = jnp.pad(x, ((0, pad_b), (0, pad_f)))
    gamma_p = jnp.pad(gamma, (0, pad_f), constant_values=1.0).reshape(1, Np)
    beta_p = jnp.pad(beta, (0, pad_f)).reshape(1, Np)
    b1_p = jnp.pad(b1, (0, pad_f)).reshape(1, Np)
    b2_p = jnp.pad(b2, (0, pad_f)).reshape(1, Np)
    # Weights kept in (out, in) layout -- no .T -- padded once and cast to the
    # MXU operand dtype here (halves weight DMA traffic when bf16).
    w1_p = jnp.pad(w1, ((0, pad_f), (0, pad_f))).astype(mxu_dtype)
    w2_p = jnp.pad(w2, ((0, pad_f), (0, pad_f))).astype(mxu_dtype)
    nvalid = jnp.array([B], dtype=jnp.int32)

    vmem = pl.BlockSpec(memory_space=pltpu.MemorySpace.VMEM)
    smem = pl.BlockSpec(memory_space=pltpu.MemorySpace.SMEM)

    out = pl.pallas_call(
        encoder_kernel,
        out_shape=jax.ShapeDtypeStruct((Bp, Np), x.dtype),
        in_specs=[smem] + [vmem] * 7,
        out_specs=vmem,
    )(nvalid, xp, gamma_p, beta_p, w1_p, b1_p, w2_p, b2_p)

    return out[:B, :N]


def _orthogonal(key, n, dtype=jnp.float32):
    """Deterministic orthogonal (gain=1) init, like nn.init.orthogonal_."""
    a = jax.random.normal(key, (n, n), dtype=jnp.float32)
    q, r = jnp.linalg.qr(a)
    q = q * jnp.sign(jnp.diagonal(r))[None, :]
    return q.astype(dtype)


def _reference(x, gamma, beta, w1, b1, w2, b2):
    mean = jnp.mean(x, axis=0, keepdims=True)
    var = jnp.mean((x - mean) ** 2, axis=0, keepdims=True)
    y = (x - mean) / jnp.sqrt(var + BN_EPS) * gamma + beta
    y = _leaky_relu(y)
    y = y @ w1.T + b1
    y = _leaky_relu(y)
    y = y @ w2.T + b2
    return y


if __name__ == "__main__":
    B, N = 8, 32  # batch, num_inputs

    key = jax.random.PRNGKey(0)
    k_x, k_w1, k_w2 = jax.random.split(key, 3)

    x = jax.random.normal(k_x, (B, N), dtype=jnp.float32)

    # Parameters initialized exactly as init_weights() prescribes:
    gamma = jnp.ones((N,), dtype=jnp.float32)    # BatchNorm1d weight = 1
    beta = jnp.zeros((N,), dtype=jnp.float32)    # BatchNorm1d bias = 0
    w1 = _orthogonal(k_w1, N)                    # Linear weight: orthogonal, gain=1
    b1 = jnp.zeros((N,), dtype=jnp.float32)      # Linear bias = 0
    w2 = _orthogonal(k_w2, N)
    b2 = jnp.zeros((N,), dtype=jnp.float32)

    out = encoder_forward(x, gamma, beta, w1, b1, w2, b2)
    out = jax.block_until_ready(out)

    ref = _reference(x, gamma, beta, w1, b1, w2, b2)
    assert out.shape == (B, N)
    assert jnp.allclose(out, ref, atol=1e-4, rtol=1e-4), "mismatch vs. pure-JAX reference"

    print("KERNEL_OK")
</pallas_src>

<mosaic_0001>
module attributes {stable_mosaic.version = 11 : i64} {
  func.func @encoder_kernel(%arg0: memref<1xi32, #tpu.memory_space<smem>>, %arg1: memref<8x128xf32, #tpu.memory_space<vmem>>, %arg2: memref<1x128xf32, #tpu.memory_space<vmem>>, %arg3: memref<1x128xf32, #tpu.memory_space<vmem>>, %arg4: memref<128x128xf32, #tpu.memory_space<vmem>>, %arg5: memref<1x128xf32, #tpu.memory_space<vmem>>, %arg6: memref<128x128xf32, #tpu.memory_space<vmem>>, %arg7: memref<1x128xf32, #tpu.memory_space<vmem>>, %arg8: memref<8x128xf32, #tpu.memory_space<vmem>>) attributes {dimension_semantics = [], scalar_prefetch = 0 : i64, scratch_operands = 0 : i64, tpu.core_type = #tpu.core_type<tc>} {
    %c0 = arith.constant 0 : index
    %c0_0 = arith.constant 0 : index
    %0 = vector.load %arg1[%c0, %c0_0] : memref<8x128xf32, #tpu.memory_space<vmem>>, vector<8x128xf32>
    %c0_1 = arith.constant 0 : index
    %1 = memref.load %arg0[%c0_1] : memref<1xi32, #tpu.memory_space<smem>>
    %2 = arith.sitofp %1 : i32 to f32
    %cst = arith.constant 1.000000e+00 : f32
    %3 = arith.divf %cst, %2 : f32
    %4 = tpu.iota {dimensions = array<i32: 0>} : vector<8x128xi32>
    %5 = vector.broadcast %1 : i32 to vector<8x128xi32>
    %6 = arith.cmpi slt, %4, %5 : vector<8x128xi32>
    %7 = arith.extui %6 : vector<8x128xi1> to vector<8x128xi32>
    %8 = arith.sitofp %7 : vector<8x128xi32> to vector<8x128xf32>
    %cst_2 = arith.constant dense<0.000000e+00> : vector<128xf32>
    %9 = vector.multi_reduction <add>, %0, %cst_2 [0] : vector<8x128xf32> to vector<128xf32>
    %10 = vector.shape_cast %9 : vector<128xf32> to vector<1x128xf32>
    %11 = vector.broadcast %3 : f32 to vector<1x128xf32>
    %12 = arith.mulf %10, %11 : vector<1x128xf32>
    %13 = vector.broadcast %12 : vector<1x128xf32> to vector<8x128xf32>
    %14 = arith.subf %0, %13 : vector<8x128xf32>
    %15 = arith.mulf %14, %8 : vector<8x128xf32>
    %16 = arith.mulf %15, %15 : vector<8x128xf32>
    %cst_3 = arith.constant dense<0.000000e+00> : vector<128xf32>
    %17 = vector.multi_reduction <add>, %16, %cst_3 [0] : vector<8x128xf32> to vector<128xf32>
    %18 = vector.shape_cast %17 : vector<128xf32> to vector<1x128xf32>
    %19 = vector.broadcast %3 : f32 to vector<1x128xf32>
    %20 = arith.mulf %18, %19 : vector<1x128xf32>
    %cst_4 = arith.constant 9.99999974E-6 : f32
    %21 = vector.broadcast %cst_4 : f32 to vector<1x128xf32>
    %22 = arith.addf %20, %21 : vector<1x128xf32>
    %23 = math.rsqrt %22 : vector<1x128xf32>
    %24 = vector.broadcast %23 : vector<1x128xf32> to vector<8x128xf32>
    %25 = arith.mulf %15, %24 : vector<8x128xf32>
    %c0_5 = arith.constant 0 : index
    %c0_6 = arith.constant 0 : index
    %26 = vector.load %arg2[%c0_5, %c0_6] : memref<1x128xf32, #tpu.memory_space<vmem>>, vector<1x128xf32>
    %27 = vector.broadcast %26 : vector<1x128xf32> to vector<8x128xf32>
    %28 = arith.mulf %25, %27 : vector<8x128xf32>
    %c0_7 = arith.constant 0 : index
    %c0_8 = arith.constant 0 : index
    %29 = vector.load %arg3[%c0_7, %c0_8] : memref<1x128xf32, #tpu.memory_space<vmem>>, vector<1x128xf32>
    %30 = vector.broadcast %29 : vector<1x128xf32> to vector<8x128xf32>
    %31 = arith.addf %28, %30 : vector<8x128xf32>
    %cst_9 = arith.constant 0.000000e+00 : f32
    %32 = vector.broadcast %cst_9 : f32 to vector<8x128xf32>
    %33 = arith.cmpf oge, %31, %32 : vector<8x128xf32>
    %cst_10 = arith.constant 2.000000e-01 : f32
    %34 = vector.broadcast %cst_10 : f32 to vector<8x128xf32>
    %35 = arith.mulf %34, %31 : vector<8x128xf32>
    %36 = arith.select %33, %31, %35 : vector<8x128xi1>, vector<8x128xf32>
    %c0_11 = arith.constant 0 : index
    %c0_12 = arith.constant 0 : index
    %37 = vector.load %arg4[%c0_11, %c0_12] : memref<128x128xf32, #tpu.memory_space<vmem>>, vector<128x128xf32>
    %cst_13 = arith.constant dense<0.000000e+00> : vector<8x128xf32>
    %38 = tpu.matmul %36, %37, %cst_13 {dimension_numbers = #tpu.dot_dimension_numbers<[1], [1], [0], [0], [0, 0, 1, 0], [], []>} : vector<8x128xf32>, vector<128x128xf32>, vector<8x128xf32> -> vector<8x128xf32>
    %c0_14 = arith.constant 0 : index
    %c0_15 = arith.constant 0 : index
    %39 = vector.load %arg5[%c0_14, %c0_15] : memref<1x128xf32, #tpu.memory_space<vmem>>, vector<1x128xf32>
    %40 = vector.broadcast %39 : vector<1x128xf32> to vector<8x128xf32>
    %41 = arith.addf %38, %40 : vector<8x128xf32>
    %cst_16 = arith.constant 0.000000e+00 : f32
    %42 = vector.broadcast %cst_16 : f32 to vector<8x128xf32>
    %43 = arith.cmpf oge, %41, %42 : vector<8x128xf32>
    %cst_17 = arith.constant 2.000000e-01 : f32
    %44 = vector.broadcast %cst_17 : f32 to vector<8x128xf32>
    %45 = arith.mulf %44, %41 : vector<8x128xf32>
    %46 = arith.select %43, %41, %45 : vector<8x128xi1>, vector<8x128xf32>
    %c0_18 = arith.constant 0 : index
    %c0_19 = arith.constant 0 : index
    %47 = vector.load %arg6[%c0_18, %c0_19] : memref<128x128xf32, #tpu.memory_space<vmem>>, vector<128x128xf32>
    %cst_20 = arith.constant dense<0.000000e+00> : vector<8x128xf32>
    %48 = tpu.matmul %46, %47, %cst_20 {dimension_numbers = #tpu.dot_dimension_numbers<[1], [1], [0], [0], [0, 0, 1, 0], [], []>} : vector<8x128xf32>, vector<128x128xf32>, vector<8x128xf32> -> vector<8x128xf32>
    %c0_21 = arith.constant 0 : index
    %c0_22 = arith.constant 0 : index
    %49 = vector.load %arg7[%c0_21, %c0_22] : memref<1x128xf32, #tpu.memory_space<vmem>>, vector<1x128xf32>
    %50 = vector.broadcast %49 : vector<1x128xf32> to vector<8x128xf32>
    %51 = arith.addf %48, %50 : vector<8x128xf32>
    %c0_23 = arith.constant 0 : index
    %c0_24 = arith.constant 0 : index
    %52 = vector.load %arg8[%c0_23, %c0_24] : memref<8x128xf32, #tpu.memory_space<vmem>>, vector<8x128xf32>
    tpu.vector_store %arg8[%c0_23, %c0_24], %51 {strides = array<i32>} : memref<8x128xf32, #tpu.memory_space<vmem>>, vector<8x128xf32>,
    return
  }
}

</mosaic_0001>

<bundles_post_ra>
// kernel: tpu_custom_call.1
= control target key start
LH: loop header
LB: loop body
LE: loop exit
PB: predicated region body
PF: predicated region fallthrough
CT: control target
= control target key end

     0   :  { %14 = vsyncpa [#allocation4], 0  ;;  %s448_s0 = inlined_call_operand.<no memory space> [shape: s32[1], index: 0, kind: input, shape index: {}]   ;;  %s449_s1 = inlined_call_operand.hbm [shape: f32[8,128], index: 1, kind: input, shape index: {}]   ;;  %s450_s2 = inlined_call_operand.vmem [shape: f32[1,128], index: 2, kind: input, shape index: {}]   ;;  %s451_s3 = inlined_call_operand.vmem [shape: f32[1,128], index: 3, kind: input, shape index: {}]   ;;  %s452_s4 = inlined_call_operand.hbm [shape: f32[128,128], index: 4, kind: input, shape index: {}]   ;;  %s453_s5 = inlined_call_operand.vmem [shape: f32[1,128], index: 5, kind: input, shape index: {}]   ;;  %s454_s6 = inlined_call_operand.hbm [shape: f32[128,128], index: 6, kind: input, shape index: {}]   ;;  %s455_s7 = inlined_call_operand.vmem [shape: f32[1,128], index: 7, kind: input, shape index: {}]   ;;  %s456_s8 = inlined_call_operand.hbm [shape: f32[8,128], index: 8, kind: output, shape index: {}]  }
   0x1   :  { %15 = vsyncpa [#allocation7], 0  ;;  %s38_s29 = sshll.u32 %s452_s4, 4  ;;  %s39_s29 = int_to_ptr.hbm [resolvable:$true] %s38_s29 }
   0x2   :  { %16 = vsyncpa [#allocation5], 0  ;;  %s366_s30 = smov [#allocation6]   ;;  %s24_s12 = sshll.u32 %s449_s1, 4  ;;  %s25_s12 = int_to_ptr.hbm [resolvable:$true] %s24_s12 }
   0x3   :  { %s40_s9 = sshll.u32 %s366_s30, 4  ;;  %s367_s13 = smov 128   ;;  %s41_s9 = int_to_ptr.vmem [resolvable:$true] %s40_s9 }
   0x4   :  { %s368_s14 = smov 8   ;;  %s369_s15 = smov [#allocation3]  }
   0x5   :  { %46 = dma.hbm_to_vmem [thread:$0]  %s39_s29, 2048, %s41_s9, [#allocation7], %s367_s13, %s367_s13, %s368_s14  }
   0x6   :  { %s26_s16 = sshll.u32 %s369_s15, 4  ;;  %s53_s19 = sshll.u32 %s454_s6, 4  ;;  %s27_s16 = int_to_ptr.vmem [resolvable:$true] %s26_s16  ;;  %s54_s19 = int_to_ptr.hbm [resolvable:$true] %s53_s19 }
   0x7   :  { %29 = dma.hbm_to_vmem [thread:$0]  %s25_s12, 128, %s27_s16, [#allocation4]  }
   0x8   :  { %s370_s4 = smov [#allocation8]  }
   0x9   :  { %s55_s20 = sshll.u32 %s370_s4, 4  ;;  %s56_s20 = int_to_ptr.vmem [resolvable:$true] %s55_s20 }
   0xa   :  { %61 = dma.hbm_to_vmem [thread:$0]  %s54_s19, 2048, %s56_s20, [#allocation7], %s367_s13, %s367_s13, %s368_s14  }
   0xb   :  { %360 = dma.done.wait [#allocation4], 128  }
   0xc   :  { %361 = vsyncadd [#allocation4], 4294967168  ;;  %s78_s22 = scvt.s32.f32 %s448_s0 }
   0xd   :  { %362 = dma.done.wait [#allocation7], 4096  }
   0xe   :  { %363 = vsyncadd [#allocation7], 4294963200  ;;  %v79_v0 = vstv %s78_s22  ;;  %v159_v1 = vld [vmem:[#allocation6 + $0x78] sm:$0xff]  ;;  %v158_v3 = vld [vmem:[#allocation6 + $0x70] sm:$0xff]  ;;  %v95_v25 = vlaneseq  ;;  %v97_v29 = vstv %s448_s0  ;;  %v371_v35 = vmov 0.0   ;;  %s372_s30 = smov [#allocation9]  }
   0xf   :  { %260 = vrcp.f32 %v79_v0  ;;  %164 = vmatpush.xpose.msra.mxu0 %v159_v1  ;;  %v91_v5 = vand.u32 2147483648, %v79_v0  ;;  %vm85_vm0 = vweird.f32 %v79_v0  ;;  %v89_v7 = vand.u32 2147483647, %v79_v0  ;;  %v157_v8 = vld [vmem:[#allocation6 + $0x68] sm:$0xff]  ;;  %v156_v14 = vld [vmem:[#allocation6 + $0x60] sm:$0xff]  ;;  %v155_v15 = vld [vmem:[#allocation6 + $0x58] sm:$0xff] }
  0x10   :  { %v76_v16 = vld [vmem:[#allocation3] sm:$0xff]  ;;  %v154_v17 = vld [vmem:[#allocation6 + $0x50] sm:$0xff]  ;;  %v153_v19 = vld [vmem:[#allocation6 + $0x48] sm:$0xff]  ;;  %v96_v28 = vshrl.u32 %v95_v25, 7  ;;  %s233_s9 = sshll.u32 %s372_s30, 4  ;;  %s235_s12 = sshll.u32 %s456_s8, 4  ;;  %s234_s9 = int_to_ptr.vmem [resolvable:$true] %s233_s9  ;;  %s236_s12 = int_to_ptr.hbm [resolvable:$true] %s235_s12 }
  0x11   :  { %v92_v10 = vor.u32 1.1754944e-38, %v91_v5  ;;  %vm90_vm3 = vcmp.eq.f32.partialorder %v89_v7, 8.507059e+37  ;;  %v101_v18 = vrot.slane %v76_v16, 4  ;;  %v152_v21 = vld [vmem:[#allocation6 + $0x40] sm:$0xff]  ;;  %v151_v23 = vld [vmem:[#allocation6 + $0x38] sm:$0xff]  ;;  %v150_v26 = vld [vmem:[#allocation6 + $0x30] sm:$0xff] }
  0x12   :  { %v149_v30 = vld [vmem:[#allocation6 + $0x28] sm:$0xff]  ;;  %vm98_vm4 = vcmp.lt.s32.totalorder %v96_v28, %v97_v29  ;;  %v148_v33 = vld [vmem:[#allocation6 + $0x20] sm:$0xff]  ;;  %v147_v38 = vld [vmem:[#allocation6 + $0x18] sm:$0xff] }
  0x13   :  { %165 = vmatpush.xpose.msra.mxu0 %v158_v3  ;;  %v102_v20 = vadd.f32 %v101_v18, %v76_v16  ;;  %v246_v36 = vsel %vm98_vm4, 1.0, %v371_v35  ;;  %v146_v41 = vld [vmem:[#allocation6 + $0x10] sm:$0xff]  ;;  %v145_v44 = vld [vmem:[#allocation6 + $0x8] sm:$0xff]  ;;  %v144_v46 = vld [vmem:[#allocation6] sm:$0xff] }
  0x14   :  { %v202_v50 = vld [vmem:[#allocation8 + $0x78] sm:$0xff]  ;;  %v201_v52 = vld [vmem:[#allocation8 + $0x70] sm:$0xff]  ;;  %v200_v54 = vld [vmem:[#allocation8 + $0x68] sm:$0xff] }
  0x15   :  { %v261_v2 = vpop.eup %260  ;;  %v103_v22 = vrot.slane %v102_v20, 2  ;;  %207 = vmatpush.xpose.msra.mxu1 %v202_v50  ;;  %v199_v55 = vld [vmem:[#allocation8 + $0x60] sm:$0xff]  ;;  %v198_v59 = vld [vmem:[#allocation8 + $0x58] sm:$0xff]  ;;  %v197_v62 = vld [vmem:[#allocation8 + $0x50] sm:$0xff] }
  0x16   :  { %v81_v4 = vmul.f32 %v261_v2, %v79_v0  ;;  %vm86_vm1 = vweird.f32 %v261_v2  ;;  %v256_v0 = vld [vmem:[%s450_s2] ss:$0 sm:$0xff] }
  0x17   :  { %vm87_vm2 = vmor %vm85_vm0, %vm86_vm1  ;;  %166 = vmatpush.xpose.msra.mxu0 %v157_v8  ;;  %v104_v24 = vadd.f32 %v103_v22, %v102_v20  ;;  %v258_v18 = vld [vmem:[%s453_s5] ss:$0 sm:$0xff] }
  0x18   :  { %v82_v6 = vsub.f32 1.0, %v81_v4  ;;  %v257_v4 = vld [vmem:[%s451_s3] ss:$0 sm:$0xff] }
  0x19   :  { %v105_v27 = vrot.slane %v104_v24, 1  ;;  %208 = vmatpush.xpose.msra.mxu1 %v201_v52 }
  0x1a   :  { %v83_v9 = vmul.f32 %v261_v2, %v82_v6  ;;  %v195_v6 = vld [vmem:[#allocation8 + $0x40] sm:$0xff] }
  0x1b   :  { %167 = vmatpush.xpose.msra.mxu0 %v156_v14  ;;  %v106_v31 = vadd.f32 %v105_v27, %v104_v24  ;;  %v190_v14 = vld [vmem:[#allocation8 + $0x18] sm:$0xff] }
  0x1c   :  { %v84_v11 = vadd.f32 %v261_v2, %v83_v9  ;;  %v194_v9 = vld [vmem:[#allocation8 + $0x38] sm:$0xff] }
  0x1d   :  { %209 = vmatpush.xpose.msra.mxu1 %v200_v54 }
  0x1e   :  { %v88_v12 = vsel %vm87_vm2, %v261_v2, %v84_v11  ;;  %v196_v2 = vld [vmem:[#allocation8 + $0x48] sm:$0xff]  ;;  %v193_v11 = vld [vmem:[#allocation8 + $0x30] sm:$0xff] }
  0x1f   :  { %v93_v13 = vsel %vm90_vm3, %v92_v10, %v88_v12  ;;  %168 = vmatpush.xpose.msra.mxu0 %v155_v15  ;;  %v192_v12 = vld [vmem:[#allocation8 + $0x28] sm:$0xff]  ;;  %v189_v15 = vld [vmem:[#allocation8 + $0x10] sm:$0xff] }
  0x20   :  { %247 = vpush %v93_v13  ;;  %v191_v13 = vld [vmem:[#allocation8 + $0x20] sm:$0xff] }
  0x21   :  { %210 = vmatpush.xpose.msra.mxu1 %v199_v55 }
  0x23   :  { %169 = vmatpush.xpose.msra.mxu0 %v154_v17  ;;  %v187_v17 = vld [vmem:[#allocation8] sm:$0xff] }
  0x25   :  { %211 = vmatpush.xpose.msra.mxu1 %v198_v59 }
  0x27   :  { %170 = vmatpush.xpose.msra.mxu0 %v153_v19 }
  0x29   :  { %212 = vmatpush.xpose.msra.mxu1 %v197_v62 }
  0x2b   :  { %171 = vmatpush.xpose.msra.mxu0 %v152_v21 }
  0x2d   :  { %213 = vmatpush.xpose.msra.mxu1 %v196_v2 }
  0x2f   :  { %172 = vmatpush.xpose.msra.mxu0 %v151_v23  ;;  %v259_v23 = vld [vmem:[%s455_s7] ss:$0 sm:$0xff] }
  0x31   :  { %214 = vmatpush.xpose.msra.mxu1 %v195_v6 }
  0x33   :  { %173 = vmatpush.xpose.msra.mxu0 %v150_v26 }
  0x35   :  { %215 = vmatpush.xpose.msra.mxu1 %v194_v9 }
  0x37   :  { %174 = vmatpush.xpose.msra.mxu0 %v149_v30 }
  0x39   :  { %216 = vmatpush.xpose.msra.mxu1 %v193_v11 }
  0x3b   :  { %175 = vmatpush.xpose.msra.mxu0 %v148_v33 }
  0x3d   :  { %217 = vmatpush.xpose.msra.mxu1 %v192_v12 }
  0x3f   :  { %176 = vmatpush.xpose.msra.mxu0 %v147_v38 }
  0x41   :  { %218 = vmatpush.xpose.msra.mxu1 %v191_v13 }
  0x43   :  { %177 = vmatpush.xpose.msra.mxu0 %v146_v41 }
  0x45   :  { %219 = vmatpush.xpose.msra.mxu1 %v190_v14 }
  0x47   :  { %178 = vmatpush.xpose.msra.mxu0 %v145_v44 }
  0x49   :  { %220 = vmatpush.xpose.msra.mxu1 %v189_v15 }
  0x4b   :  { %179 = vmatpush.xpose.msra.mxu0 %v144_v46 }
  0x51   :  { %s248_s24 = spop %247 }
  0x52   :  { %v107_v32 = vstv %s248_s24 }
  0x53   :  { %v108_v34 = vmul.f32 %v107_v32, %v106_v31 }
  0x55   :  { %v109_v37 = vsub.f32 %v76_v16, %v108_v34  ;;  %v188_v16 = vld [vmem:[#allocation8 + $0x8] sm:$0xff] }
  0x56   :  { %221 = vmatpush.xpose.msra.mxu1 %v188_v16 }
  0x57   :  { %v110_v39 = vmul.f32 %v246_v36, %v109_v37 }
  0x59   :  { %v111_v40 = vmul.f32 %v110_v39, %v110_v39 }
  0x5a   :  { %222 = vmatpush.xpose.msra.mxu1 %v187_v17 }
  0x5b   :  { %v112_v42 = vrot.slane %v111_v40, 4 }
  0x5d   :  { %v113_v43 = vadd.f32 %v112_v42, %v111_v40 }
  0x5f   :  { %v114_v45 = vrot.slane %v113_v43, 2 }
  0x61   :  { %v115_v47 = vadd.f32 %v114_v45, %v113_v43 }
  0x63   :  { %v116_v48 = vrot.slane %v115_v47, 1 }
  0x65   :  { %v117_v49 = vadd.f32 %v116_v48, %v115_v47 }
  0x67   :  { %v118_v51 = vmul.f32 %v117_v49, %v107_v32 }
  0x69   :  { %v119_v53 = vadd.f32 1e-05, %v118_v51 }
  0x6b   :  { %262 = vrsqrt.f32 %v119_v53  ;;  %vm126_vm6 = vweird.f32 %v119_v53 }
  0x71   :  { %v263_v56 = vpop.eup %262 }
  0x72   :  { %v121_v57 = vmul.f32 %v263_v56, %v119_v53  ;;  %vm127_vm5 = vweird.f32 %v263_v56 }
  0x73   :  { %vm128_vm7 = vmor %vm126_vm6, %vm127_vm5 }
  0x74   :  { %v122_v58 = vmul.f32 %v263_v56, %v121_v57 }
  0x76   :  { %v123_v60 = vmul.f32 0.5, %v122_v58 }
  0x78   :  { %v124_v61 = vsub.f32 1.5, %v123_v60 }
  0x7a   :  { %v125_v63 = vmul.f32 %v263_v56, %v124_v61 }
  0x7c   :  { %v129_v1 = vsel %vm128_vm7, %v263_v56, %v125_v63 }
  0x7d   :  { %v130_v3 = vmul.f32 %v129_v1, %v110_v39 }
  0x7f   :  { %v135_v5 = vmul.f32 %v256_v0, %v130_v3 }
  0x81   :  { %v140_v7 = vadd.f32 %v257_v4, %v135_v5 }
  0x83   :  { %vm141_vm8 = vcmp.ge.f32.partialorder %v140_v7, 0.0  ;;  %v142_v8 = vmul.f32 0.2, %v140_v7 }
  0x85   :  { %v143_v10 = vsel %vm141_vm8, %v140_v7, %v142_v8 }
  0x86   :  { %180 = vmatmul.f32.vlgmr.msra.gmra.mxu0 %v143_v10 }
 0x103   :  { %v181_v19 = vpop.f32.mrf.mxu0 }
 0x104   :  { %v182_v20 = vadd.f32 %v258_v18, %v181_v19 }
 0x106   :  { %vm184_vm9 = vcmp.ge.f32.partialorder %v182_v20, 0.0  ;;  %v185_v21 = vmul.f32 0.2, %v182_v20 }
 0x108   :  { %v186_v22 = vsel %vm184_vm9, %v182_v20, %v185_v21 }
 0x109   :  { %223 = vmatmul.f32.vlgmr.msra.gmra.mxu1 %v186_v22 }
 0x186   :  { %v224_v24 = vpop.f32.mrf.mxu1 }
 0x187   :  { %v225_v25 = vadd.f32 %v259_v23, %v224_v24 }
 0x189   :  { %227 = vst [vmem:[#allocation9] sm:$0xff] %v225_v25 }
 0x18a   :  { %238 = dma.vmem_to_hbm [thread:$0]  %s234_s9, 128, %s236_s12, [#allocation5]  }
 0x18b   :  { %364 = dma.done.wait [#allocation5], 128  }
 0x18c   :  { %365 = vsyncadd [#allocation5], 4294967168 }
 0x18d   :  { %243 = vsyncpa [#allocation4], 1 }
 0x18e   :  { %244 = vsyncpa [#allocation7], 1 }
 0x18f   :  { %245 = vsyncpa [#allocation5], 1 }

</bundles_post_ra>
